<compile_context>
chip_gen: v5e
topology: v5e:2x2
jax: 0.10.0
libtpu: 0.0.40
codegen_flags: <defaults>
</compile_context>

<pallas_src>
import math

import jax
import jax.numpy as jnp
from jax.experimental import pallas as pl
from jax.experimental.pallas import tpu as pltpu


def cayley(w):
    """Q = (I + S) @ inv(I - S),  S = 0.5 * (w - w.T)."""
    # TODO(synk): dense matrix inverse has no Pallas primitive; stays in plain JAX.
    w = w.astype(jnp.float32)
    skew = 0.5 * (w - w.T)
    eye = jnp.eye(w.shape[0], dtype=jnp.float32)
    # (I + S) @ inv(I - S)  ==  solve((I - S).T, (I + S).T).T
    return jnp.linalg.solve((eye - skew).T, (eye + skew).T).T


def _round_up(a, b):
    return (a + b - 1) // b * b


# ---------------------------------------------------------------------------
# Fused kernel: batched gather (one-hot @ weight-chunk) + rotation (@ Q.T)
# ---------------------------------------------------------------------------
def _gather_rotate_kernel(ids_ref, w_ref, qt_ref, o_ref, acc_ref):
    """Grid = (token_tiles, vocab_chunks); vocab is the (reduction) axis."""
    n_idx = pl.program_id(1)

    @pl.when(n_idx == 0)
    def _():
        acc_ref[...] = jnp.zeros_like(acc_ref)

    tile_t = ids_ref.shape[0]
    tile_n = w_ref.shape[0]

    ids = ids_ref[...]                                           # (TILE_T, 1) int32
    col = n_idx * tile_n + jax.lax.broadcasted_iota(
        jnp.int32, (tile_t, tile_n), 1)                          # (TILE_T, TILE_N)
    onehot = (ids == col).astype(jnp.float32)                    # row selector
    # Batched gather on the MXU: rows weight[ids] restricted to this vocab chunk.
    acc_ref[...] += jnp.dot(onehot, w_ref[...].astype(jnp.float32),
                            preferred_element_type=jnp.float32)

    @pl.when(n_idx == pl.num_programs(1) - 1)
    def _():
        # Rotation: gathered_rows @ Q.T  (Q.T held resident in VMEM).
        o_ref[...] = jnp.dot(acc_ref[...], qt_ref[...],
                             preferred_element_type=jnp.float32
                             ).astype(o_ref.dtype)


# ---------------------------------------------------------------------------
# Forward
# ---------------------------------------------------------------------------
def soft_embedding_forward(x, weight, soft_R):
    """x: int token ids (any shape); weight: (N, D); soft_R: (D, D).

    Returns x.shape + (D,) with out[...] = weight[x] @ cayley(soft_R).T.
    """
    N, D = weight.shape
    orig_shape = x.shape

    q = cayley(soft_R)          # (D, D) float32
    qt = q.T                    # updated_weight = weight @ Q.T  (keep f32 precision)

    # Clamp ids (out-of-range ids would otherwise silently select wrong rows).
    flat_ids = jnp.clip(x.reshape(-1).astype(jnp.int32), 0, N - 1)
    T = flat_ids.shape[0]

    # ---- tile sizing ------------------------------------------------------
    # Token tile: sublane-dense (multiple of 8), large enough to amortize the
    # ~0.35us per-grid-step overhead and give unmasked (8,128) output stores.
    tile_t = min(256, _round_up(T, 8))
    t_pad = _round_up(T, tile_t)
    # Vocab (reduction) chunk: keep the double-buffered (tile_n, D) weight chunk
    # and the (tile_t, tile_n) one-hot intermediate a few MiB so the kernel fits
    # comfortably inside every generation's scoped VMEM (incl. v7x 64 MiB).
    row_bytes = D * 4
    budget = 2 * 1024 * 1024
    tile_n = max(8, min(_round_up(N, 8), 1024, (budget // row_bytes) // 8 * 8))
    n_pad = _round_up(N, tile_n)

    ids2 = jnp.pad(flat_ids, (0, t_pad - T)).reshape(t_pad, 1)
    w = weight
    if n_pad != N:
        w = jnp.pad(w, ((0, n_pad - N), (0, 0)))

    grid = (t_pad // tile_t, n_pad // tile_n)

    out = pl.pallas_call(
        _gather_rotate_kernel,
        out_shape=jax.ShapeDtypeStruct((t_pad, D), weight.dtype),
        grid_spec=pltpu.PrefetchScalarGridSpec(
            num_scalar_prefetch=0,
            grid=grid,
            in_specs=[
                pl.BlockSpec((tile_t, 1), lambda i, n: (i, 0)),    # token ids
                pl.BlockSpec((tile_n, D), lambda i, n: (n, 0)),    # weight chunk
                pl.BlockSpec((D, D), lambda i, n: (0, 0)),         # Q.T (resident)
            ],
            out_specs=pl.BlockSpec((tile_t, D), lambda i, n: (i, 0)),
            scratch_shapes=[pltpu.VMEM((tile_t, D), jnp.float32)],
        ),
        compiler_params=pltpu.CompilerParams(
            dimension_semantics=("parallel", "arbitrary")),
    )(ids2, w, qt)

    return out[:T].reshape(*orig_shape, D)


if __name__ == "__main__":
    num_embeddings = 256   # N (vocab)
    embedding_dim = 128    # D (= self.r in the module)
    batch, seq = 2, 8

    key = jax.random.PRNGKey(0)
    k_w, k_r, k_x = jax.random.split(key, 3)

    # weight: kaiming_normal_ equivalent (fan_in = embedding_dim, gain = sqrt(2))
    kaiming_std = math.sqrt(2.0 / embedding_dim)
    weight = kaiming_std * jax.random.normal(
        k_w, (num_embeddings, embedding_dim), dtype=jnp.float32
    )
    # soft_R: module __init__ zero-inits this (=> Q == I). Use small deterministic
    # values instead so the Cayley rotation / matmul path is actually exercised.
    soft_R = 0.02 * jax.random.normal(
        k_r, (embedding_dim, embedding_dim), dtype=jnp.float32
    )
    x = jax.random.randint(k_x, (batch, seq), 0, num_embeddings, dtype=jnp.int32)

    out = soft_embedding_forward(x, weight, soft_R)
    out = jax.block_until_ready(out)
    assert out.shape == (batch, seq, embedding_dim)

    # Pure-JAX reference for the same math.
    q_ref = cayley(soft_R)
    ref = (weight @ q_ref.T)[x]
    assert jnp.allclose(out, ref, atol=1e-4, rtol=1e-4), (
        float(jnp.max(jnp.abs(out - ref)))
    )

    print("KERNEL_OK")
</pallas_src>

<mosaic_0001>
module attributes {stable_mosaic.version = 11 : i64} {
  func.func @_gather_rotate_kernel(%arg0: i32, %arg1: i32, %arg2: memref<16x1xi32, #tpu.memory_space<vmem>>, %arg3: memref<256x128xf32, #tpu.memory_space<vmem>>, %arg4: memref<128x128xf32, #tpu.memory_space<vmem>>, %arg5: memref<16x128xf32, #tpu.memory_space<vmem>>, %arg6: memref<16x128xf32, #tpu.memory_space<vmem>>) attributes {dimension_semantics = [#tpu.dimension_semantics<parallel>, #tpu.dimension_semantics<arbitrary>], iteration_bounds = array<i64: 1, 1>, scalar_prefetch = 0 : i64, scratch_operands = 1 : i64, tpu.core_type = #tpu.core_type<tc>, window_params = [{transform_indices = @transform_0, window_bounds = array<i64: 16, 1>}, {transform_indices = @transform_1, window_bounds = array<i64: 256, 128>}, {pipeline_mode = #tpu.pipeline_mode<synchronous>, transform_indices = @transform_2, window_bounds = array<i64: 128, 128>}, {transform_indices = @transform_3, window_bounds = array<i64: 16, 128>}]} {
    %c0_i32 = arith.constant 0 : i32
    %0 = arith.cmpi eq, %arg1, %c0_i32 : i32
    %1 = arith.extui %0 : i1 to i32
    %c0_i32_0 = arith.constant 0 : i32
    %2 = arith.cmpi ne, %1, %c0_i32_0 : i32
    scf.if %2 {
      %cst_10 = arith.constant 0.000000e+00 : f32
      %20 = vector.broadcast %cst_10 : f32 to vector<16x128xf32>
      %c0_11 = arith.constant 0 : index
      %c0_12 = arith.constant 0 : index
      %21 = vector.load %arg6[%c0_11, %c0_12] : memref<16x128xf32, #tpu.memory_space<vmem>>, vector<16x128xf32>
      tpu.vector_store %arg6[%c0_11, %c0_12], %20 {strides = array<i32>} : memref<16x128xf32, #tpu.memory_space<vmem>>, vector<16x128xf32>,
    } else {
    }
    %c0 = arith.constant 0 : index
    %c0_1 = arith.constant 0 : index
    %3 = vector.load %arg2[%c0, %c0_1] : memref<16x1xi32, #tpu.memory_space<vmem>>, vector<16x1xi32>
    %c256_i32 = arith.constant 256 : i32
    %4 = arith.muli %arg1, %c256_i32 : i32
    %5 = tpu.iota {dimensions = array<i32: 1>} : vector<16x256xi32>
    %6 = vector.broadcast %4 : i32 to vector<16x256xi32>
    %7 = arith.addi %6, %5 : vector<16x256xi32>
    %8 = vector.broadcast %3 : vector<16x1xi32> to vector<16x256xi32>
    %9 = arith.cmpi eq, %8, %7 : vector<16x256xi32>
    %10 = arith.extui %9 : vector<16x256xi1> to vector<16x256xi32>
    %11 = arith.sitofp %10 : vector<16x256xi32> to vector<16x256xf32>
    %c0_2 = arith.constant 0 : index
    %c0_3 = arith.constant 0 : index
    %12 = vector.load %arg6[%c0_2, %c0_3] : memref<16x128xf32, #tpu.memory_space<vmem>>, vector<16x128xf32>
    %c0_4 = arith.constant 0 : index
    %c0_5 = arith.constant 0 : index
    %13 = vector.load %arg3[%c0_4, %c0_5] : memref<256x128xf32, #tpu.memory_space<vmem>>, vector<256x128xf32>
    %cst = arith.constant dense<0.000000e+00> : vector<16x128xf32>
    %14 = tpu.matmul %11, %13, %cst {dimension_numbers = #tpu.dot_dimension_numbers<[1], [0], [0], [1], [0, 0, 1, 1], [], []>} : vector<16x256xf32>, vector<256x128xf32>, vector<16x128xf32> -> vector<16x128xf32>
    %15 = arith.addf %12, %14 : vector<16x128xf32>
    %c0_6 = arith.constant 0 : index
    %c0_7 = arith.constant 0 : index
    %16 = vector.load %arg6[%c0_6, %c0_7] : memref<16x128xf32, #tpu.memory_space<vmem>>, vector<16x128xf32>
    tpu.vector_store %arg6[%c0_6, %c0_7], %15 {strides = array<i32>} : memref<16x128xf32, #tpu.memory_space<vmem>>, vector<16x128xf32>,
    %c0_i32_8 = arith.constant 0 : i32
    %17 = arith.cmpi eq, %arg1, %c0_i32_8 : i32
    %18 = arith.extui %17 : i1 to i32
    %c0_i32_9 = arith.constant 0 : i32
    %19 = arith.cmpi ne, %18, %c0_i32_9 : i32
    scf.if %19 {
      %c0_10 = arith.constant 0 : index
      %c0_11 = arith.constant 0 : index
      %20 = vector.load %arg6[%c0_10, %c0_11] : memref<16x128xf32, #tpu.memory_space<vmem>>, vector<16x128xf32>
      %c0_12 = arith.constant 0 : index
      %c0_13 = arith.constant 0 : index
      %21 = vector.load %arg4[%c0_12, %c0_13] : memref<128x128xf32, #tpu.memory_space<vmem>>, vector<128x128xf32>
      %cst_14 = arith.constant dense<0.000000e+00> : vector<16x128xf32>
      %22 = tpu.matmul %20, %21, %cst_14 {dimension_numbers = #tpu.dot_dimension_numbers<[1], [0], [0], [1], [0, 0, 1, 1], [], []>} : vector<16x128xf32>, vector<128x128xf32>, vector<16x128xf32> -> vector<16x128xf32>
      %c0_15 = arith.constant 0 : index
      %c0_16 = arith.constant 0 : index
      %23 = vector.load %arg5[%c0_15, %c0_16] : memref<16x128xf32, #tpu.memory_space<vmem>>, vector<16x128xf32>
      tpu.vector_store %arg5[%c0_15, %c0_16], %22 {strides = array<i32>} : memref<16x128xf32, #tpu.memory_space<vmem>>, vector<16x128xf32>,
    } else {
    }
    return
  }
  func.func @transform_0(%arg0: i32, %arg1: i32) -> (i32, i32) {
    %c0_i32 = arith.constant 0 : i32
    %c0_i32_0 = arith.constant 0 : i32
    return %arg0, %c0_i32 : i32, i32
  }
  func.func @transform_1(%arg0: i32, %arg1: i32) -> (i32, i32) {
    %c0_i32 = arith.constant 0 : i32
    %c0_i32_0 = arith.constant 0 : i32
    return %arg1, %c0_i32 : i32, i32
  }
  func.func @transform_2(%arg0: i32, %arg1: i32) -> (i32, i32) {
    %c0_i32 = arith.constant 0 : i32
    %c0_i32_0 = arith.constant 0 : i32
    %c0_i32_1 = arith.constant 0 : i32
    return %c0_i32, %c0_i32_0 : i32, i32
  }
  func.func @transform_3(%arg0: i32, %arg1: i32) -> (i32, i32) {
    %c0_i32 = arith.constant 0 : i32
    %c0_i32_0 = arith.constant 0 : i32
    return %arg0, %c0_i32 : i32, i32
  }
}

</mosaic_0001>

<bundles_post_ra>
// kernel: tpu_custom_call.1
= control target key start
LH: loop header
LB: loop body
LE: loop exit
PB: predicated region body
PF: predicated region fallthrough
CT: control target
= control target key end

     0   :  { %8 = vsyncpa [#allocation4], 0  ;;  %s391_s0 = inlined_call_operand.vmem [shape: s32[16,1], index: 0, kind: input, shape index: {}]   ;;  %s392_s1 = inlined_call_operand.hbm [shape: f32[256,128], index: 1, kind: input, shape index: {}]   ;;  %s393_s2 = inlined_call_operand.hbm [shape: f32[128,128], index: 2, kind: input, shape index: {}]   ;;  %s394_s3 = inlined_call_operand.hbm [shape: f32[16,128], index: 3, kind: output, shape index: {}]  }
   0x1   :  { %9 = vsyncpa [#allocation7], 0 }
   0x2   :  { %10 = vsyncpa [#allocation5], 0  ;;  %s17_s14 = sshll.u32 %s392_s1, 4  ;;  %s340_s15 = smov [#allocation3]   ;;  %s18_s14 = int_to_ptr.hbm [resolvable:$true] %s17_s14 }
   0x3   :  { %s19_s16 = sshll.u32 %s340_s15, 4  ;;  %s30_s19 = sshll.u32 %s393_s2, 4  ;;  %s20_s16 = int_to_ptr.vmem [resolvable:$true] %s19_s16  ;;  %s31_s19 = int_to_ptr.hbm [resolvable:$true] %s30_s19 }
   0x4   :  { %s341_s20 = smov 128   ;;  %s342_s21 = smov 8  }
   0x5   :  { %25 = dma.hbm_to_vmem [thread:$0]  %s18_s14, 4096, %s20_s16, [#allocation4], %s341_s20, %s341_s20, %s342_s21  }
   0x6   :  { %s343_s22 = smov [#allocation6]  }
   0x7   :  { %s32_s23 = sshll.u32 %s343_s22, 4  ;;  %s33_s23 = int_to_ptr.vmem [resolvable:$true] %s32_s23 }
   0x8   :  { %38 = dma.hbm_to_vmem [thread:$0]  %s31_s19, 2048, %s33_s23, [#allocation7], %s341_s20, %s341_s20, %s342_s21  }
   0x9   :  { %334 = dma.done.wait [#allocation4], 4096  }
   0xa   :  { %335 = vsyncadd [#allocation4], 4294963200 }
   0xb   :  { %336 = dma.done.wait [#allocation7], 2048  }
   0xc   :  { %337 = vsyncadd [#allocation7], 4294965248  ;;  %v344_v0 = vmov 0   ;;  %v53_v1 = vld [vmem:[%s391_s0] sm:$0xff]  ;;  %v97_v2 = vld [vmem:[#allocation3 + $0x78] sm:$0xff]  ;;  %v56_v42 = vlaneseq  ;;  %v345_v52 = vmov 1.0  }
   0xd   :  { %261 = vset.pattern.permute.xlu0 %v344_v0  ;;  %114 = vmatpush.msra.mxu0 %v97_v2  ;;  %v113_v3 = vld [vmem:[#allocation3 + $0xf8] sm:$0xff]  ;;  %v96_v4 = vld [vmem:[#allocation3 + $0x70] sm:$0xff]  ;;  %v95_v6 = vld [vmem:[#allocation3 + $0x68] sm:$0xff]  ;;  %s216_s29 = sshll.u32 %s394_s3, 4  ;;  %s217_s29 = int_to_ptr.hbm [resolvable:$true] %s216_s29 }
   0xe   :  { %63 = vperm.xlu0 %261, %v53_v1   ;;  %v112_v5 = vld [vmem:[#allocation3 + $0xf0] sm:$0xff]  ;;  %137 = vmatpush.msra.mxu1 %v113_v3  ;;  %v111_v7 = vld [vmem:[#allocation3 + $0xe8] sm:$0xff]  ;;  %v94_v8 = vld [vmem:[#allocation3 + $0x60] sm:$0xff]  ;;  %v57_v45 = vand.u32 127, %v56_v42 }
   0xf   :  { %238 = vmatpush.msra.mxu3 %v97_v2  ;;  %115 = vmatpush.msra.mxu0 %v96_v4  ;;  %v110_v9 = vld [vmem:[#allocation3 + $0xe0] sm:$0xff]  ;;  %v54_v10 = vld [vmem:[%s391_s0 + $0x8] sm:$0xff]  ;;  %v93_v11 = vld [vmem:[#allocation3 + $0x58] sm:$0xff]  ;;  %s346_s0 = smov [#allocation8]  }
  0x10   :  { %138 = vmatpush.msra.mxu1 %v112_v5  ;;  %v109_v12 = vld [vmem:[#allocation3 + $0xd8] sm:$0xff]  ;;  %v92_v13 = vld [vmem:[#allocation3 + $0x50] sm:$0xff]  ;;  %v91_v15 = vld [vmem:[#allocation3 + $0x48] sm:$0xff]  ;;  %v58_v48 = vadd.s32 128, %v57_v45  ;;  %s214_s26 = sshll.u32 %s346_s0, 4  ;;  %s215_s26 = int_to_ptr.vmem [resolvable:$true] %s214_s26 }
  0x11   :  { %239 = vmatpush.msra.mxu3 %v96_v4  ;;  %116 = vmatpush.msra.mxu0 %v95_v6  ;;  %v108_v14 = vld [vmem:[#allocation3 + $0xd0] sm:$0xff]  ;;  %v107_v16 = vld [vmem:[#allocation3 + $0xc8] sm:$0xff]  ;;  %v90_v17 = vld [vmem:[#allocation3 + $0x40] sm:$0xff] }
  0x12   :  { %139 = vmatpush.msra.mxu1 %v111_v7  ;;  %v106_v18 = vld [vmem:[#allocation3 + $0xc0] sm:$0xff]  ;;  %v89_v19 = vld [vmem:[#allocation3 + $0x38] sm:$0xff]  ;;  %v88_v21 = vld [vmem:[#allocation3 + $0x30] sm:$0xff] }
  0x13   :  { %240 = vmatpush.msra.mxu3 %v95_v6  ;;  %117 = vmatpush.msra.mxu0 %v94_v8  ;;  %v105_v20 = vld [vmem:[#allocation3 + $0xb8] sm:$0xff]  ;;  %v104_v22 = vld [vmem:[#allocation3 + $0xb0] sm:$0xff]  ;;  %v87_v23 = vld [vmem:[#allocation3 + $0x28] sm:$0xff] }
  0x14   :  { %140 = vmatpush.msra.mxu1 %v110_v9  ;;  %v103_v24 = vld [vmem:[#allocation3 + $0xa8] sm:$0xff]  ;;  %v86_v25 = vld [vmem:[#allocation3 + $0x20] sm:$0xff]  ;;  %v85_v27 = vld [vmem:[#allocation3 + $0x18] sm:$0xff] }
  0x15   :  { %241 = vmatpush.msra.mxu3 %v94_v8  ;;  %118 = vmatpush.msra.mxu0 %v93_v11  ;;  %v102_v26 = vld [vmem:[#allocation3 + $0xa0] sm:$0xff]  ;;  %v101_v28 = vld [vmem:[#allocation3 + $0x98] sm:$0xff]  ;;  %v84_v29 = vld [vmem:[#allocation3 + $0x10] sm:$0xff] }
  0x16   :  { %66 = vperm.xlu0 %261, %v54_v10   ;;  %141 = vmatpush.msra.mxu1 %v109_v12  ;;  %v100_v30 = vld [vmem:[#allocation3 + $0x90] sm:$0xff]  ;;  %v83_v31 = vld [vmem:[#allocation3 + $0x8] sm:$0xff]  ;;  %v82_v33 = vld [vmem:[#allocation3] sm:$0xff] }
  0x17   :  { %242 = vmatpush.msra.mxu3 %v93_v11  ;;  %119 = vmatpush.msra.mxu0 %v92_v13  ;;  %v99_v32 = vld [vmem:[#allocation3 + $0x88] sm:$0xff]  ;;  %v98_v34 = vld [vmem:[#allocation3 + $0x80] sm:$0xff]  ;;  %v184_v35 = vld [vmem:[#allocation6 + $0x78] sm:$0xff] }
  0x18   :  { %142 = vmatpush.msra.mxu1 %v108_v14  ;;  %v183_v36 = vld [vmem:[#allocation6 + $0x70] sm:$0xff]  ;;  %185 = vmatpush.msra.mxu2 %v184_v35  ;;  %v182_v37 = vld [vmem:[#allocation6 + $0x68] sm:$0xff]  ;;  %v181_v38 = vld [vmem:[#allocation6 + $0x60] sm:$0xff] }
  0x19   :  { %243 = vmatpush.msra.mxu3 %v92_v13  ;;  %120 = vmatpush.msra.mxu0 %v91_v15  ;;  %v180_v39 = vld [vmem:[#allocation6 + $0x58] sm:$0xff]  ;;  %v179_v40 = vld [vmem:[#allocation6 + $0x50] sm:$0xff]  ;;  %v178_v41 = vld [vmem:[#allocation6 + $0x48] sm:$0xff] }
  0x1a   :  { %143 = vmatpush.msra.mxu1 %v107_v16  ;;  %186 = vmatpush.msra.mxu2 %v183_v36  ;;  %v177_v43 = vld [vmem:[#allocation6 + $0x40] sm:$0xff]  ;;  %v176_v44 = vld [vmem:[#allocation6 + $0x38] sm:$0xff]  ;;  %v175_v46 = vld [vmem:[#allocation6 + $0x30] sm:$0xff] }
  0x1b   :  { %244 = vmatpush.msra.mxu3 %v91_v15  ;;  %121 = vmatpush.msra.mxu0 %v90_v17  ;;  %v174_v47 = vld [vmem:[#allocation6 + $0x28] sm:$0xff]  ;;  %v173_v49 = vld [vmem:[#allocation6 + $0x20] sm:$0xff]  ;;  %v172_v51 = vld [vmem:[#allocation6 + $0x18] sm:$0xff] }
  0x1c   :  { %144 = vmatpush.msra.mxu1 %v106_v18  ;;  %187 = vmatpush.msra.mxu2 %v182_v37  ;;  %v171_v53 = vld [vmem:[#allocation6 + $0x10] sm:$0xff]  ;;  %v170_v55 = vld [vmem:[#allocation6 + $0x8] sm:$0xff]  ;;  %v169_v56 = vld [vmem:[#allocation6] sm:$0xff] }
  0x1d   :  { %245 = vmatpush.msra.mxu3 %v90_v17  ;;  %122 = vmatpush.msra.mxu0 %v89_v19 }
  0x1e   :  { %145 = vmatpush.msra.mxu1 %v105_v20  ;;  %188 = vmatpush.msra.mxu2 %v181_v38 }
  0x1f   :  { %246 = vmatpush.msra.mxu3 %v89_v19  ;;  %123 = vmatpush.msra.mxu0 %v88_v21 }
  0x20   :  { %146 = vmatpush.msra.mxu1 %v104_v22  ;;  %189 = vmatpush.msra.mxu2 %v180_v39 }
  0x21   :  { %247 = vmatpush.msra.mxu3 %v88_v21  ;;  %124 = vmatpush.msra.mxu0 %v87_v23 }
  0x22   :  { %147 = vmatpush.msra.mxu1 %v103_v24  ;;  %190 = vmatpush.msra.mxu2 %v179_v40 }
  0x23   :  { %248 = vmatpush.msra.mxu3 %v87_v23  ;;  %125 = vmatpush.msra.mxu0 %v86_v25 }
  0x24   :  { %148 = vmatpush.msra.mxu1 %v102_v26  ;;  %191 = vmatpush.msra.mxu2 %v178_v41 }
  0x25   :  { %249 = vmatpush.msra.mxu3 %v86_v25  ;;  %126 = vmatpush.msra.mxu0 %v85_v27 }
  0x26   :  { %149 = vmatpush.msra.mxu1 %v101_v28  ;;  %192 = vmatpush.msra.mxu2 %v177_v43 }
  0x27   :  { %250 = vmatpush.msra.mxu3 %v85_v27  ;;  %127 = vmatpush.msra.mxu0 %v84_v29 }
  0x28   :  { %150 = vmatpush.msra.mxu1 %v100_v30  ;;  %193 = vmatpush.msra.mxu2 %v176_v44 }
  0x29   :  { %251 = vmatpush.msra.mxu3 %v84_v29  ;;  %128 = vmatpush.msra.mxu0 %v83_v31 }
  0x2a   :  { %151 = vmatpush.msra.mxu1 %v99_v32  ;;  %194 = vmatpush.msra.mxu2 %v175_v46 }
  0x2b   :  { %252 = vmatpush.msra.mxu3 %v83_v31  ;;  %129 = vmatpush.msra.mxu0 %v82_v33 }
  0x2c   :  { %152 = vmatpush.msra.mxu1 %v98_v34  ;;  %195 = vmatpush.msra.mxu2 %v174_v47 }
  0x2d   :  { %253 = vmatpush.msra.mxu3 %v82_v33 }
  0x2e   :  { %196 = vmatpush.msra.mxu2 %v173_v49 }
  0x30   :  { %197 = vmatpush.msra.mxu2 %v172_v51 }
  0x32   :  { %198 = vmatpush.msra.mxu2 %v171_v53 }
  0x34   :  { %199 = vmatpush.msra.mxu2 %v170_v55 }
  0x36   :  { %200 = vmatpush.msra.mxu2 %v169_v56 }
  0x80   :  { %v64_v50 = vpop.permute.xlu0 %63 }
  0x81   :  { %vm68_vm0 = vcmp.eq.s32.totalorder %v64_v50, %v57_v45  ;;  %vm69_vm1 = vcmp.eq.s32.totalorder %v64_v50, %v58_v48 }
  0x82   :  { %234 = vmatmul.msk.f32.vlgmr.msra.gmra.mxu0 %vm68_vm0, %v345_v52  ;;  %236 = vmatmul.msk.f32.vlgmr.msra.gmra.mxu1 %vm69_vm1, %v345_v52 }
  0x88   :  { %v67_v54 = vpop.permute.xlu0 %66 }
  0x89   :  { %vm70_vm2 = vcmp.eq.s32.totalorder %v67_v54, %v57_v45  ;;  %vm71_vm3 = vcmp.eq.s32.totalorder %v67_v54, %v58_v48 }
  0x8a   :  { %235 = vmatmul.msk.f32.vlgmr.msra.gmra.mxu3 %vm70_vm2, %v345_v52  ;;  %237 = vmatmul.msk.f32.gmra.mxu1 %vm71_vm3, %v345_v52 }
  0xff   :  { %v131_v57 = vpop.f32.mrf.mxu0  ;;  %v154_v58 = vpop.f32.mrf.mxu1 }
 0x100   :  { %v155_v59 = vadd.f32 %v154_v58, %v131_v57 }
 0x102   :  { %201 = vmatmul.f32.vlgmr.msra.gmra.mxu2 %v155_v59 }
 0x107   :  { %v157_v60 = vpop.f32.mrf.mxu1 }
 0x10d   :  { %v134_v61 = vpop.f32.mrf.mxu3 }
 0x10e   :  { %v158_v62 = vadd.f32 %v157_v60, %v134_v61 }
 0x110   :  { %204 = vmatmul.f32.gmra.mxu2 %v158_v62 }
 0x185   :  { %v202_v63 = vpop.f32.mrf.mxu2 }
 0x186   :  { %208 = vst [vmem:[#allocation8] sm:$0xff] %v202_v63 }
 0x193   :  { %v205_v0 = vpop.f32.mrf.mxu2 }
 0x194   :  { %209 = vst [vmem:[#allocation8 + $0x8] sm:$0xff] %v205_v0 }
 0x195   :  { %222 = dma.vmem_to_hbm [thread:$0]  %s215_s26, 256, %s217_s29, [#allocation5], %s341_s20, %s341_s20, %s342_s21  }
 0x196   :  { %338 = dma.done.wait [#allocation5], 256  }
 0x197   :  { %339 = vsyncadd [#allocation5], 4294967040 }
 0x198   :  { %227 = vsyncpa [#allocation4], 1 }
 0x199   :  { %228 = vsyncpa [#allocation7], 1 }
 0x19a   :  { %229 = vsyncpa [#allocation5], 1 }

</bundles_post_ra>
